<compile_context>
chip_gen: v6e
topology: v6e:2x2x1
jax: 0.10.0
libtpu: 0.0.40
codegen_flags: <defaults>
</compile_context>

<pallas_src>
import jax
import jax.numpy as jnp
from jax.experimental import pallas as pl
from jax.experimental.pallas import tpu as pltpu

N_PAD = 128  # lane-dense width for the 10-class output layer


def mlp_kernel(x_ref, w1_ref, b1_ref, w2_ref, b2_ref, o_ref):
    # In-kernel bf16 cast of the activation tile (VPU; hidden under the DMA).
    x = x_ref[...].astype(jnp.bfloat16)

    # Layer 1: bf16 MXU matmul with f32 accumulation, f32 bias.
    h = jnp.dot(x, w1_ref[...], preferred_element_type=jnp.float32)
    h = h + b1_ref[...]
    # Sigmoid via a single EUP op: sigmoid(h) = 0.5 * tanh(0.5*h) + 0.5
    h = 0.5 * jnp.tanh(0.5 * h) + 0.5

    # Layer 2: lane-dense (256 -> 128 padded) bf16 matmul, f32 accumulation.
    logits = jnp.dot(h.astype(jnp.bfloat16), w2_ref[...],
                     preferred_element_type=jnp.float32)
    logits = logits + b2_ref[...]            # padded lanes carry -1e30 (f32)

    # Softmax over the padded 128 lanes; padded lanes -> exp(very negative) = 0.
    m = jnp.max(logits, axis=-1, keepdims=True)
    e = jnp.exp(logits - m)
    denom = jnp.sum(e, axis=-1, keepdims=True)
    o_ref[...] = (e / denom).astype(o_ref.dtype)   # exact normalization, bf16 store


def _round_up(n, m):
    return (n + m - 1) // m * m


def network_forward(x, w1, b1, w2, b2, *, tb=1024):
    """x: [B, 784]; w1: [784, 256]; b1: [256] or [1,256]; w2: [256, 10]; b2: [10] or [1,10].
    Weights are stored [in, out] (transposed vs PyTorch) so the kernel computes x @ W + b."""
    B, D_in = x.shape
    H = w1.shape[1]
    D_out = w2.shape[1]

    # Weight prep (tiny, one-time): bf16 weights; f32 biases; pad the 10-class
    # layer to a lane-dense 128 columns with -1e30 bias lanes (vanish in softmax).
    w1_b = w1.astype(jnp.bfloat16)
    b1_f = b1.reshape(1, -1).astype(jnp.float32)
    w2_p = jnp.zeros((H, N_PAD), jnp.bfloat16).at[:, :D_out].set(w2.astype(jnp.bfloat16))
    b2_p = jnp.full((1, N_PAD), -1e30, jnp.float32).at[:, :D_out].set(
        b2.reshape(1, -1).astype(jnp.float32))

    # Batch tile: multiple of 8 sublanes, capped at `tb`; no padded copy of x.
    TB = min(_round_up(tb, 8), _round_up(B, 8))
    if -(-B // TB) == 1 and B >= 16:
        # Guarantee >= 2 grid steps so v7x's two TensorCores both get work.
        TB = _round_up(-(-B // 2), 8)
    grid = (pl.cdiv(B, TB),)   # last tile may be partial; OOB rows are masked

    out = pl.pallas_call(
        mlp_kernel,
        out_shape=jax.ShapeDtypeStruct((B, N_PAD), jnp.bfloat16),
        grid=grid,
        in_specs=[
            pl.BlockSpec((TB, D_in), lambda i: (i, 0)),     # x tile: pipelines over batch
            pl.BlockSpec((D_in, H), lambda i: (0, 0)),      # W1: VMEM-resident
            pl.BlockSpec((1, H), lambda i: (0, 0)),         # b1
            pl.BlockSpec((H, N_PAD), lambda i: (0, 0)),     # W2 (padded, lane-dense)
            pl.BlockSpec((1, N_PAD), lambda i: (0, 0)),     # b2 (padded with -1e30)
        ],
        out_specs=pl.BlockSpec((TB, N_PAD), lambda i: (i, 0)),
        compiler_params=pltpu.CompilerParams(
            dimension_semantics=("parallel",),              # v7x: shard batch over 2 TCs
            vmem_limit_bytes=32 * 1024 * 1024,              # headroom for TB up to ~2048 (v5e-safe)
        ),
    )(x, w1_b, b1_f, w2_p, b2_p)

    # Tiny slice/cast over B x 10; keeps module semantics (f32 probabilities).
    return out[:, :D_out].astype(jnp.float32)


def init_params(key):
    """Deterministic init mimicking nn.Linear's U(-1/sqrt(fan_in), 1/sqrt(fan_in))."""
    k1, k2, k3, k4 = jax.random.split(key, 4)
    bound1 = 1.0 / jnp.sqrt(784.0)
    bound2 = 1.0 / jnp.sqrt(256.0)
    # Stored as [in, out] (transpose of PyTorch's [out, in]) so kernel does x @ W.
    w1 = jax.random.uniform(k1, (784, 256), jnp.float32, -bound1, bound1)
    b1 = jax.random.uniform(k2, (1, 256), jnp.float32, -bound1, bound1)
    w2 = jax.random.uniform(k3, (256, 10), jnp.float32, -bound2, bound2)
    b2 = jax.random.uniform(k4, (1, 10), jnp.float32, -bound2, bound2)
    return w1, b1, w2, b2


def _reference(x, w1, b1, w2, b2):
    h = jax.nn.sigmoid(x @ w1 + b1)
    return jax.nn.softmax(h @ w2 + b2, axis=-1)


if __name__ == "__main__":
    key = jax.random.PRNGKey(0)
    kx, kp = jax.random.split(key)
    w1, b1, w2, b2 = init_params(kp)

    # Case 1: small batch, single grid step.
    B_small = 8
    x_small = jax.random.normal(kx, (B_small, 784), jnp.float32)
    out_small = jax.block_until_ready(network_forward(x_small, w1, b1, w2, b2))
    ref_small = _reference(x_small, w1, b1, w2, b2)
    assert out_small.shape == (B_small, 10)
    assert jnp.allclose(out_small, ref_small, atol=2e-2), "small-batch mismatch"
    assert jnp.allclose(jnp.sum(out_small, axis=-1), 1.0, atol=1e-2)

    # Case 2: larger batch — exercises the >=2-step grid (TB halved for v7x)
    # and the partial last tile (200 rows over TB=104 tiles, masked remainder).
    B_big = 200
    x_big = jax.random.normal(kx, (B_big, 784), jnp.float32)
    out_big = jax.block_until_ready(network_forward(x_big, w1, b1, w2, b2))
    ref_big = _reference(x_big, w1, b1, w2, b2)
    assert out_big.shape == (B_big, 10)
    assert jnp.allclose(out_big, ref_big, atol=2e-2), "multi-tile mismatch"
    assert jnp.allclose(jnp.sum(out_big, axis=-1), 1.0, atol=1e-2)

    print("KERNEL_OK")
</pallas_src>

<mosaic_0001>
module attributes {stable_mosaic.version = 11 : i64} {
  func.func @mlp_kernel(%arg0: i32, %arg1: memref<8x784xf32, #tpu.memory_space<vmem>>, %arg2: memref<784x256xbf16, #tpu.memory_space<vmem>>, %arg3: memref<1x256xf32, #tpu.memory_space<vmem>>, %arg4: memref<256x128xbf16, #tpu.memory_space<vmem>>, %arg5: memref<1x128xf32, #tpu.memory_space<vmem>>, %arg6: memref<8x128xbf16, #tpu.memory_space<vmem>>) attributes {dimension_semantics = [#tpu.dimension_semantics<parallel>], iteration_bounds = array<i64: 1>, scalar_prefetch = 0 : i64, scratch_operands = 0 : i64, tpu.core_type = #tpu.core_type<tc>, window_params = [{transform_indices = @transform_0, window_bounds = array<i64: 8, 784>}, {pipeline_mode = #tpu.pipeline_mode<synchronous>, transform_indices = @transform_1, window_bounds = array<i64: 784, 256>}, {pipeline_mode = #tpu.pipeline_mode<synchronous>, transform_indices = @transform_2, window_bounds = array<i64: 1, 256>}, {pipeline_mode = #tpu.pipeline_mode<synchronous>, transform_indices = @transform_3, window_bounds = array<i64: 256, 128>}, {pipeline_mode = #tpu.pipeline_mode<synchronous>, transform_indices = @transform_4, window_bounds = array<i64: 1, 128>}, {transform_indices = @transform_5, window_bounds = array<i64: 8, 128>}]} {
    %c0 = arith.constant 0 : index
    %c0_0 = arith.constant 0 : index
    %0 = vector.load %arg1[%c0, %c0_0] : memref<8x784xf32, #tpu.memory_space<vmem>>, vector<8x784xf32>
    %1 = arith.truncf %0 : vector<8x784xf32> to vector<8x784xbf16>
    %c0_1 = arith.constant 0 : index
    %c0_2 = arith.constant 0 : index
    %2 = vector.load %arg2[%c0_1, %c0_2] : memref<784x256xbf16, #tpu.memory_space<vmem>>, vector<784x256xbf16>
    %cst = arith.constant dense<0.000000e+00> : vector<8x256xf32>
    %3 = tpu.matmul %1, %2, %cst {dimension_numbers = #tpu.dot_dimension_numbers<[1], [0], [0], [1], [0, 0, 1, 1], [], []>} : vector<8x784xbf16>, vector<784x256xbf16>, vector<8x256xf32> -> vector<8x256xf32>
    %c0_3 = arith.constant 0 : index
    %c0_4 = arith.constant 0 : index
    %4 = vector.load %arg3[%c0_3, %c0_4] : memref<1x256xf32, #tpu.memory_space<vmem>>, vector<1x256xf32>
    %5 = vector.broadcast %4 : vector<1x256xf32> to vector<8x256xf32>
    %6 = arith.addf %3, %5 : vector<8x256xf32>
    %cst_5 = arith.constant 5.000000e-01 : f32
    %7 = vector.broadcast %cst_5 : f32 to vector<8x256xf32>
    %8 = arith.mulf %7, %6 : vector<8x256xf32>
    %9 = math.tanh %8 : vector<8x256xf32>
    %cst_6 = arith.constant 5.000000e-01 : f32
    %10 = vector.broadcast %cst_6 : f32 to vector<8x256xf32>
    %11 = arith.mulf %10, %9 : vector<8x256xf32>
    %cst_7 = arith.constant 5.000000e-01 : f32
    %12 = vector.broadcast %cst_7 : f32 to vector<8x256xf32>
    %13 = arith.addf %11, %12 : vector<8x256xf32>
    %14 = arith.truncf %13 : vector<8x256xf32> to vector<8x256xbf16>
    %c0_8 = arith.constant 0 : index
    %c0_9 = arith.constant 0 : index
    %15 = vector.load %arg4[%c0_8, %c0_9] : memref<256x128xbf16, #tpu.memory_space<vmem>>, vector<256x128xbf16>
    %cst_10 = arith.constant dense<0.000000e+00> : vector<8x128xf32>
    %16 = tpu.matmul %14, %15, %cst_10 {dimension_numbers = #tpu.dot_dimension_numbers<[1], [0], [0], [1], [0, 0, 1, 1], [], []>} : vector<8x256xbf16>, vector<256x128xbf16>, vector<8x128xf32> -> vector<8x128xf32>
    %c0_11 = arith.constant 0 : index
    %c0_12 = arith.constant 0 : index
    %17 = vector.load %arg5[%c0_11, %c0_12] : memref<1x128xf32, #tpu.memory_space<vmem>>, vector<1x128xf32>
    %18 = vector.broadcast %17 : vector<1x128xf32> to vector<8x128xf32>
    %19 = arith.addf %16, %18 : vector<8x128xf32>
    %cst_13 = arith.constant dense<0xFF800000> : vector<8xf32>
    %20 = vector.multi_reduction <maximumf>, %19, %cst_13 [1] : vector<8x128xf32> to vector<8xf32>
    %21 = vector.shape_cast %20 : vector<8xf32> to vector<8x1xf32>
    %22 = vector.broadcast %21 : vector<8x1xf32> to vector<8x128xf32>
    %23 = arith.subf %19, %22 : vector<8x128xf32>
    %24 = math.exp %23 : vector<8x128xf32>
    %cst_14 = arith.constant dense<0.000000e+00> : vector<8xf32>
    %25 = vector.multi_reduction <add>, %24, %cst_14 [1] : vector<8x128xf32> to vector<8xf32>
    %26 = vector.shape_cast %25 : vector<8xf32> to vector<8x1xf32>
    %27 = vector.broadcast %26 : vector<8x1xf32> to vector<8x128xf32>
    %28 = arith.divf %24, %27 : vector<8x128xf32>
    %29 = arith.truncf %28 : vector<8x128xf32> to vector<8x128xbf16>
    %c0_15 = arith.constant 0 : index
    %c0_16 = arith.constant 0 : index
    %30 = vector.load %arg6[%c0_15, %c0_16] : memref<8x128xbf16, #tpu.memory_space<vmem>>, vector<8x128xbf16>
    tpu.vector_store %arg6[%c0_15, %c0_16], %29 {strides = array<i32>} : memref<8x128xbf16, #tpu.memory_space<vmem>>, vector<8x128xbf16>,
    return
  }
  func.func @transform_0(%arg0: i32) -> (i32, i32) {
    %c0_i32 = arith.constant 0 : i32
    %c0_i32_0 = arith.constant 0 : i32
    return %arg0, %c0_i32 : i32, i32
  }
  func.func @transform_1(%arg0: i32) -> (i32, i32) {
    %c0_i32 = arith.constant 0 : i32
    %c0_i32_0 = arith.constant 0 : i32
    %c0_i32_1 = arith.constant 0 : i32
    return %c0_i32, %c0_i32_0 : i32, i32
  }
  func.func @transform_2(%arg0: i32) -> (i32, i32) {
    %c0_i32 = arith.constant 0 : i32
    %c0_i32_0 = arith.constant 0 : i32
    %c0_i32_1 = arith.constant 0 : i32
    return %c0_i32, %c0_i32_0 : i32, i32
  }
  func.func @transform_3(%arg0: i32) -> (i32, i32) {
    %c0_i32 = arith.constant 0 : i32
    %c0_i32_0 = arith.constant 0 : i32
    %c0_i32_1 = arith.constant 0 : i32
    return %c0_i32, %c0_i32_0 : i32, i32
  }
  func.func @transform_4(%arg0: i32) -> (i32, i32) {
    %c0_i32 = arith.constant 0 : i32
    %c0_i32_0 = arith.constant 0 : i32
    %c0_i32_1 = arith.constant 0 : i32
    return %c0_i32, %c0_i32_0 : i32, i32
  }
  func.func @transform_5(%arg0: i32) -> (i32, i32) {
    %c0_i32 = arith.constant 0 : i32
    %c0_i32_0 = arith.constant 0 : i32
    return %arg0, %c0_i32 : i32, i32
  }
}

</mosaic_0001>

<bundles_post_ra>
// kernel: tpu_custom_call.1
= control target key start
LH: loop header
LB: loop body
LE: loop exit
PB: predicated region body
PF: predicated region fallthrough
CT: control target
= control target key end

     0   :  { %10 = vsyncpa [#allocation3], 0  ;;  %s1517_s0 = inlined_call_operand.hbm [shape: f32[8,784], index: 0, kind: input, shape index: {}]   ;;  %s1518_s1 = inlined_call_operand.hbm [shape: bf16[784,256], index: 1, kind: input, shape index: {}]   ;;  %s1519_s2 = inlined_call_operand.vmem [shape: f32[1,256], index: 2, kind: input, shape index: {}]   ;;  %s1520_s3 = inlined_call_operand.hbm [shape: bf16[256,128], index: 3, kind: input, shape index: {}]   ;;  %s1521_s4 = inlined_call_operand.vmem [shape: f32[1,128], index: 4, kind: input, shape index: {}]   ;;  %s1522_s5 = inlined_call_operand.hbm [shape: bf16[8,128], index: 5, kind: output, shape index: {}]  }
   0x1   :  { %11 = vsyncpa [#allocation6], 0 }
   0x2   :  { %12 = vsyncpa [#allocation4], 0  ;;  %s1459_s18 = smov [#allocation5]  }
   0x3   :  { %s28_s19 = sshll.u32 %s1459_s18, 4  ;;  %s29_s19 = int_to_ptr.vmem [resolvable:$true] %s28_s19 }
   0x4   :  { %s1381_s20 = scalar_lea.vmem %s29_s19, 12544  ;;  %p1386_p1 = scmp.lt.s32.totalorder %s29_s19, %s29_s19 }
   0x5   :  { %p1382_p0 = scmp.ne.s32.totalorder %s29_s19, %s1381_s20  ;;  %p1387_p2 = scmp.lt.s32.totalorder %s1381_s20, %s1381_s20 }
   0x7   :  { %p1388_p3 = por %p1387_p2, %p1386_p1 }
   0x9   :  { %p1389_p4 = pnand %p1388_p3, %p1382_p0 }
   0xb   :  { %1392 = shalt.err (!%p1389_p4)
}
   0xc   :  { %s1460_s21 = smov 128   ;;  %s1461_s22 = smov 8  }
   0xd   :  { %34 = dma.hbm_to_vmem [thread:$0]  %s1518_s1, 12544, %s29_s19, [#allocation6], %s1460_s21, %s1460_s21, %s1461_s22  }
   0xe   :  { %s1462_s25 = smov [#allocation2]   ;;  %s1463_s27 = smov [#allocation7]  }
   0xf   :  { %s19_s26 = sshll.u32 %s1462_s25, 4  ;;  %s42_s28 = sshll.u32 %s1463_s27, 4  ;;  %s20_s26 = int_to_ptr.vmem [resolvable:$true] %s19_s26  ;;  %s43_s28 = int_to_ptr.vmem [resolvable:$true] %s42_s28 }
  0x10   :  { %s1401_s29 = scalar_lea.vmem %s20_s26, 896  ;;  %p1406_p6 = scmp.lt.s32.totalorder %s20_s26, %s20_s26 }
  0x11   :  { %p1402_p5 = scmp.ne.s32.totalorder %s20_s26, %s1401_s29  ;;  %p1407_p7 = scmp.lt.s32.totalorder %s1401_s29, %s1401_s29 }
  0x13   :  { %p1408_p8 = por %p1407_p7, %p1406_p6 }
  0x15   :  { %p1409_p9 = pnand %p1408_p8, %p1402_p5 }
  0x17   :  { %1412 = shalt.err (!%p1409_p9)
}
  0x18   :  { %22 = dma.hbm_to_vmem [thread:$0]  %s1517_s0, 896, %s20_s26, [#allocation3]  }
  0x19   :  { %s1421_s7 = scalar_lea.vmem %s43_s28, 2048  ;;  %p1426_p11 = scmp.lt.s32.totalorder %s43_s28, %s43_s28 }
  0x1a   :  { %p1422_p10 = scmp.ne.s32.totalorder %s43_s28, %s1421_s7  ;;  %p1427_p12 = scmp.lt.s32.totalorder %s1421_s7, %s1421_s7 }
  0x1c   :  { %p1428_p13 = por %p1427_p12, %p1426_p11 }
  0x1e   :  { %p1429_p0 = pnand %p1428_p13, %p1422_p10 }
  0x20   :  { %1432 = shalt.err (!%p1429_p0)
}
  0x21   :  { %s1464_s1 = smov 64   ;;  %s1465_s8 = smov 4  }
  0x22   :  { %48 = dma.hbm_to_vmem [thread:$0]  %s1520_s3, 2048, %s43_s28, [#allocation6], %s1464_s1, %s1464_s1, %s1465_s8  }
  0x23   :  { %1453 = dma.done.wait [#allocation3], 896  }
  0x24   :  { %1454 = vsyncadd [#allocation3], 4294966400 }
  0x25   :  { %1455 = dma.done.wait [#allocation6], 14592  }
  0x26   :  { %1456 = vsyncadd [#allocation6], 4294952704  ;;  %v1202_v0 = vld [vmem:[#allocation5 + $0x74] ss:$8 sps:$4 sm:$0xff]   ;;  %v1204_v1 = vld [vmem:[#allocation5 + $0x70] ss:$8 sps:$4 sm:$0xff]  }
  0x27   :  { %679 = vmatprep.subr.bf16.mxu0 %v1202_v0  ;;  %v1205_v2 = vld [vmem:[#allocation5 + $0x174] ss:$8 sps:$4 sm:$0xff]   ;;  %v1207_v3 = vld [vmem:[#allocation5 + $0x170] ss:$8 sps:$4 sm:$0xff]   ;;  %v1208_v4 = vld [vmem:[#allocation5 + $0x64] ss:$8 sps:$4 sm:$0xff]  }
  0x28   :  { %680 = vmatpush1.bf16.msra.mxu0 %v1204_v1  ;;  %v1210_v5 = vld [vmem:[#allocation5 + $0x60] ss:$8 sps:$4 sm:$0xff]   ;;  %720 = vmatprep.subr.bf16.mxu1 %v1205_v2  ;;  %v1211_v6 = vld [vmem:[#allocation5 + $0x164] ss:$8 sps:$4 sm:$0xff]   ;;  %v1214_v8 = vld [vmem:[#allocation5 + $0x54] ss:$8 sps:$4 sm:$0xff]  }
  0x29   :  { %721 = vmatpush1.bf16.msra.mxu1 %v1207_v3  ;;  %681 = vmatprep.subr.bf16.mxu0 %v1208_v4  ;;  %v1213_v7 = vld [vmem:[#allocation5 + $0x160] ss:$8 sps:$4 sm:$0xff]   ;;  %v1216_v9 = vld [vmem:[#allocation5 + $0x50] ss:$8 sps:$4 sm:$0xff]   ;;  %v1217_v10 = vld [vmem:[#allocation5 + $0x154] ss:$8 sps:$4 sm:$0xff]  }
  0x2a   :  { %722 = vmatprep.subr.bf16.mxu1 %v1211_v6  ;;  %v1220_v11 = vld [vmem:[#allocation5 + $0x44] ss:$8 sps:$4 sm:$0xff]   ;;  %v1219_v12 = vld [vmem:[#allocation5 + $0x150] ss:$8 sps:$4 sm:$0xff]   ;;  %v1222_v14 = vld [vmem:[#allocation5 + $0x40] ss:$8 sps:$4 sm:$0xff]  }
  0x2b   :  { %v1223_v13 = vld [vmem:[#allocation5 + $0x144] ss:$8 sps:$4 sm:$0xff]   ;;  %v1226_v15 = vld [vmem:[#allocation5 + $0x34] ss:$8 sps:$4 sm:$0xff]   ;;  %v1225_v16 = vld [vmem:[#allocation5 + $0x140] ss:$8 sps:$4 sm:$0xff]  }
  0x2c   :  { %682 = vmatpush1.bf16.msra.mxu0 %v1210_v5  ;;  %v1229_v17 = vld [vmem:[#allocation5 + $0x134] ss:$8 sps:$4 sm:$0xff]   ;;  %v1228_v18 = vld [vmem:[#allocation5 + $0x30] ss:$8 sps:$4 sm:$0xff]   ;;  %v1232_v19 = vld [vmem:[#allocation5 + $0x24] ss:$8 sps:$4 sm:$0xff]  }
  0x2d   :  { %683 = vmatprep.subr.bf16.mxu0 %v1214_v8  ;;  %723 = vmatpush1.bf16.msra.mxu1 %v1213_v7  ;;  %v1231_v20 = vld [vmem:[#allocation5 + $0x130] ss:$8 sps:$4 sm:$0xff]   ;;  %v1235_v21 = vld [vmem:[#allocation5 + $0x124] ss:$8 sps:$4 sm:$0xff]   ;;  %v1234_v22 = vld [vmem:[#allocation5 + $0x20] ss:$8 sps:$4 sm:$0xff]  }
  0x2e   :  { %724 = vmatprep.subr.bf16.mxu1 %v1217_v10  ;;  %v1238_v23 = vld [vmem:[#allocation5 + $0x14] ss:$8 sps:$4 sm:$0xff]   ;;  %v1237_v24 = vld [vmem:[#allocation5 + $0x120] ss:$8 sps:$4 sm:$0xff]   ;;  %v1240_v26 = vld [vmem:[#allocation5 + $0x10] ss:$8 sps:$4 sm:$0xff]  }
  0x2f   :  { %v1241_v25 = vld [vmem:[#allocation5 + $0x114] ss:$8 sps:$4 sm:$0xff]   ;;  %v1244_v27 = vld [vmem:[#allocation5 + $0x4] ss:$8 sps:$4 sm:$0xff]   ;;  %v1243_v28 = vld [vmem:[#allocation5 + $0x110] ss:$8 sps:$4 sm:$0xff]  }
  0x30   :  { %684 = vmatpush1.bf16.msra.mxu0 %v1216_v9  ;;  %v1247_v29 = vld [vmem:[#allocation5 + $0x104] ss:$8 sps:$4 sm:$0xff]   ;;  %v1246_v30 = vld [vmem:[#allocation5] ss:$8 sps:$4 sm:$0xff]   ;;  %v1250_v31 = vld [vmem:[#allocation5 + $0xf4] ss:$8 sps:$4 sm:$0xff]  }
  0x31   :  { %685 = vmatprep.subr.bf16.mxu0 %v1220_v11  ;;  %725 = vmatpush1.bf16.msra.mxu1 %v1219_v12  ;;  %v1249_v32 = vld [vmem:[#allocation5 + $0x100] ss:$8 sps:$4 sm:$0xff]   ;;  %v1253_v33 = vld [vmem:[#allocation5 + $0x1f4] ss:$8 sps:$4 sm:$0xff]   ;;  %v1252_v34 = vld [vmem:[#allocation5 + $0xf0] ss:$8 sps:$4 sm:$0xff]  }
  0x32   :  { %726 = vmatprep.subr.bf16.mxu1 %v1223_v13  ;;  %v1256_v35 = vld [vmem:[#allocation5 + $0xe4] ss:$8 sps:$4 sm:$0xff]   ;;  %v1255_v36 = vld [vmem:[#allocation5 + $0x1f0] ss:$8 sps:$4 sm:$0xff]   ;;  %v1258_v38 = vld [vmem:[#allocation5 + $0xe0] ss:$8 sps:$4 sm:$0xff]  }
  0x33   :  { %v1259_v37 = vld [vmem:[#allocation5 + $0x1e4] ss:$8 sps:$4 sm:$0xff]   ;;  %v1262_v39 = vld [vmem:[#allocation5 + $0xd4] ss:$8 sps:$4 sm:$0xff]   ;;  %v1261_v40 = vld [vmem:[#allocation5 + $0x1e0] ss:$8 sps:$4 sm:$0xff]  }
  0x34   :  { %686 = vmatpush1.bf16.msra.mxu0 %v1222_v14  ;;  %v1265_v41 = vld [vmem:[#allocation5 + $0x1d4] ss:$8 sps:$4 sm:$0xff]   ;;  %v1264_v42 = vld [vmem:[#allocation5 + $0xd0] ss:$8 sps:$4 sm:$0xff]   ;;  %v1268_v43 = vld [vmem:[#allocation5 + $0xc4] ss:$8 sps:$4 sm:$0xff]  }
  0x35   :  { %687 = vmatprep.subr.bf16.mxu0 %v1226_v15  ;;  %727 = vmatpush1.bf16.msra.mxu1 %v1225_v16  ;;  %v1267_v44 = vld [vmem:[#allocation5 + $0x1d0] ss:$8 sps:$4 sm:$0xff]   ;;  %v1271_v45 = vld [vmem:[#allocation5 + $0x1c4] ss:$8 sps:$4 sm:$0xff]   ;;  %v1270_v47 = vld [vmem:[#allocation5 + $0xc0] ss:$8 sps:$4 sm:$0xff]  }
  0x36   :  { %728 = vmatprep.subr.bf16.mxu1 %v1229_v17  ;;  %v62_v46 = vld [vmem:[#allocation2 + $0x8] sm:$0xff]  ;;  %v64_v50 = vld [vmem:[#allocation2 + $0x18] sm:$0xff]  ;;  %v61_v4 = vld [vmem:[#allocation2] sm:$0xff]  ;;  %vm675_vm0 = vcmask 130048   ;;  %s1467_s12 = smov [#allocation8]  }
  0x37   :  { %v69_v48 = vpack.c.bf16 %v62_v46, %v62_v46  ;;  %v1274_v49 = vld [vmem:[#allocation5 + $0xb4] ss:$8 sps:$4 sm:$0xff]   ;;  %v1273_v51 = vld [vmem:[#allocation5 + $0x1c0] ss:$8 sps:$4 sm:$0xff]   ;;  %v71_v52 = vpack.c.bf16 %v64_v50, %v64_v50  ;;  %v1276_v54 = vld [vmem:[#allocation5 + $0xb0] ss:$8 sps:$4 sm:$0xff]   ;;  %v68_v7 = vpack.c.bf16 %v61_v4, %v61_v4 }
  0x38   :  { %688 = vmatpush1.bf16.msra.mxu0 %v1228_v18  ;;  %v1277_v53 = vld [vmem:[#allocation5 + $0x1b4] ss:$8 sps:$4 sm:$0xff]   ;;  %v1280_v55 = vld [vmem:[#allocation5 + $0xa4] ss:$8 sps:$4 sm:$0xff]   ;;  %v1279_v56 = vld [vmem:[#allocation5 + $0x1b0] ss:$8 sps:$4 sm:$0xff]  }
  0x39   :  { %689 = vmatprep.subr.bf16.mxu0 %v1232_v19  ;;  %729 = vmatpush1.bf16.msra.mxu1 %v1231_v20  ;;  %v1283_v57 = vld [vmem:[#allocation5 + $0x1a4] ss:$8 sps:$4 sm:$0xff]   ;;  %v1282_v58 = vld [vmem:[#allocation5 + $0xa0] ss:$8 sps:$4 sm:$0xff]   ;;  %v1286_v59 = vld [vmem:[#allocation5 + $0x94] ss:$8 sps:$4 sm:$0xff]  }
  0x3a   :  { %730 = vmatprep.subr.bf16.mxu1 %v1235_v21  ;;  %711 = vmatprep.mubr.bf16.mxu0 %v69_v48  ;;  %v1285_v60 = vld [vmem:[#allocation5 + $0x1a0] ss:$8 sps:$4 sm:$0xff]   ;;  %v1289_v61 = vld [vmem:[#allocation5 + $0x194] ss:$8 sps:$4 sm:$0xff]   ;;  %v1288_v62 = vld [vmem:[#allocation5 + $0x90] ss:$8 sps:$4 sm:$0xff]  }
  0x3b   :  { %752 = vmatprep.mubr.bf16.mxu1 %v71_v52  ;;  %v1292_v63 = vld [vmem:[#allocation5 + $0x84] ss:$8 sps:$4 sm:$0xff]   ;;  %v1291_v0 = vld [vmem:[#allocation5 + $0x190] ss:$8 sps:$4 sm:$0xff]   ;;  %v1294_v1 = vld [vmem:[#allocation5 + $0x80] ss:$8 sps:$4 sm:$0xff]  }
  0x3c   :  { %690 = vmatpush1.bf16.msra.mxu0 %v1234_v22  ;;  %v1295_v2 = vld [vmem:[#allocation5 + $0x184] ss:$8 sps:$4 sm:$0xff]   ;;  %v1297_v3 = vld [vmem:[#allocation5 + $0x180] ss:$8 sps:$4 sm:$0xff]   ;;  %v1300_v5 = vld [vmem:[#allocation5 + $0x274] ss:$8 sps:$4 sm:$0xff]  }
  0x3d   :  { %691 = vmatprep.subr.bf16.mxu0 %v1238_v23  ;;  %731 = vmatpush1.bf16.msra.mxu1 %v1237_v24  ;;  %v63_v6 = vld [vmem:[#allocation2 + $0x10] sm:$0xff]  ;;  %v1303_v9 = vld [vmem:[#allocation5 + $0x264] ss:$8 sps:$4 sm:$0xff]   ;;  %v1343_v11 = vld [vmem:[#allocation5 + $0x300] ss:$8 sps:$4 sm:$0xff]   ;;  %v1466_v19 = vmov 0  }
  0x3e   :  { %732 = vmatprep.subr.bf16.mxu1 %v1241_v25  ;;  %v1298_v8 = vld [vmem:[#allocation5 + $0x270] ss:$8 sps:$4 sm:$0xff]   ;;  %v70_v10 = vpack.c.bf16 %v63_v6, %v63_v6  ;;  %v1345_v12 = vld [vmem:[#allocation5 + $0x304] ss:$8 sps:$4 sm:$0xff]   ;;  %v1301_v13 = vld [vmem:[#allocation5 + $0x260] ss:$8 sps:$4 sm:$0xff]  }
  0x3f   :  { %v1306_v14 = vld [vmem:[#allocation5 + $0x254] ss:$8 sps:$4 sm:$0xff]   ;;  %v1304_v18 = vld [vmem:[#allocation5 + $0x250] ss:$8 sps:$4 sm:$0xff]   ;;  %v1309_v20 = vld [vmem:[#allocation5 + $0x244] ss:$8 sps:$4 sm:$0xff]  }
  0x40   :  { %692 = vmatpush1.bf16.msra.mxu0 %v1240_v26  ;;  %v67_v15 = vld [vmem:[#allocation2 + $0x30] sm:$0xff]  ;;  %v66_v16 = vld [vmem:[#allocation2 + $0x28] sm:$0xff]  ;;  %v1307_v22 = vld [vmem:[#allocation5 + $0x240] ss:$8 sps:$4 sm:$0xff]   ;;  %s1045_s13 = sshll.u32 %s1467_s12, 4  ;;  %s1046_s13 = int_to_ptr.vmem [resolvable:$true] %s1045_s13 }
  0x41   :  { %693 = vmatprep.subr.bf16.mxu0 %v1244_v27  ;;  %733 = vmatpush1.bf16.msra.mxu1 %v1243_v28  ;;  %v73_v17 = vpack.c.bf16 %v66_v16, %v66_v16  ;;  %v74_v21 = vpack.c.bf16 %v67_v15, %v67_v15  ;;  %v1312_v23 = vld [vmem:[#allocation5 + $0x234] ss:$8 sps:$4 sm:$0xff]   ;;  %v1310_v24 = vld [vmem:[#allocation5 + $0x230] ss:$8 sps:$4 sm:$0xff]   ;;  %v1315_v25 = vld [vmem:[#allocation5 + $0x224] ss:$8 sps:$4 sm:$0xff]   ;;  %p1438_p2 = scmp.lt.s32.totalorder %s1046_s13, %s1046_s13 }
  0x42   :  { %734 = vmatprep.subr.bf16.mxu1 %v1247_v29  ;;  %v1313_v26 = vld [vmem:[#allocation5 + $0x220] ss:$8 sps:$4 sm:$0xff]   ;;  %v1318_v27 = vld [vmem:[#allocation5 + $0x214] ss:$8 sps:$4 sm:$0xff]   ;;  %v1316_v28 = vld [vmem:[#allocation5 + $0x210] ss:$8 sps:$4 sm:$0xff]  }
  0x43   :  { %v1321_v29 = vld [vmem:[#allocation5 + $0x204] ss:$8 sps:$4 sm:$0xff]   ;;  %v1346_v46 = vld [vmem:[#allocation5 + $0x280] ss:$8 sps:$4 sm:$0xff]  }
  0x44   :  { %694 = vmatpush1.bf16.msra.mxu0 %v1246_v30  ;;  %v1319_v30 = vld [vmem:[#allocation5 + $0x200] ss:$8 sps:$4 sm:$0xff]  }
  0x45   :  { %695 = vmatprep.subr.bf16.mxu0 %v1250_v31  ;;  %735 = vmatpush1.bf16.msra.mxu1 %v1249_v32  ;;  %v1324_v31 = vld [vmem:[#allocation5 + $0x2f4] ss:$8 sps:$4 sm:$0xff]   ;;  %v1322_v32 = vld [vmem:[#allocation5 + $0x2f0] ss:$8 sps:$4 sm:$0xff]   ;;  %v1350_v50 = vld [vmem:[#allocation7 + $0x38] sm:$0xff]  }
  0x46   :  { %736 = vmatprep.subr.bf16.mxu1 %v1253_v33  ;;  %v1327_v33 = vld [vmem:[#allocation5 + $0x2e4] ss:$8 sps:$4 sm:$0xff]   ;;  %v173_v16 = vld [vmem:[%s1519_s2] sm:$0x3] }
  0x47   :  { %v1352_v52 = vld [vmem:[#allocation7 + $0x30] sm:$0xff]  }
  0x48   :  { %696 = vmatpush2.bf16.msra.mxu0 %v1252_v34  ;;  %v1325_v34 = vld [vmem:[#allocation5 + $0x2e0] ss:$8 sps:$4 sm:$0xff]  }
  0x49   :  { %697 = vmatprep.subr.bf16.mxu0 %v1256_v35  ;;  %737 = vmatpush2.bf16.msra.mxu1 %v1255_v36  ;;  %v1330_v35 = vld [vmem:[#allocation5 + $0x2d4] ss:$8 sps:$4 sm:$0xff]   ;;  %v1328_v36 = vld [vmem:[#allocation5 + $0x2d0] ss:$8 sps:$4 sm:$0xff]  }
  0x4a   :  { %738 = vmatprep.subr.bf16.mxu1 %v1259_v37  ;;  %v1333_v37 = vld [vmem:[#allocation5 + $0x2c4] ss:$8 sps:$4 sm:$0xff]  }
  0x4c   :  { %698 = vmatpush2.bf16.msra.mxu0 %v1258_v38  ;;  %v1331_v38 = vld [vmem:[#allocation5 + $0x2c0] ss:$8 sps:$4 sm:$0xff]  }
  0x4d   :  { %699 = vmatprep.subr.bf16.mxu0 %v1262_v39  ;;  %739 = vmatpush2.bf16.msra.mxu1 %v1261_v40  ;;  %v1336_v39 = vld [vmem:[#allocation5 + $0x2b4] ss:$8 sps:$4 sm:$0xff]   ;;  %v1334_v40 = vld [vmem:[#allocation5 + $0x2b0] ss:$8 sps:$4 sm:$0xff]  }
  0x4e   :  { %740 = vmatprep.subr.bf16.mxu1 %v1265_v41  ;;  %v1339_v41 = vld [vmem:[#allocation5 + $0x2a4] ss:$8 sps:$4 sm:$0xff]  }
  0x50   :  { %700 = vmatpush2.bf16.msra.mxu0 %v1264_v42  ;;  %v1337_v42 = vld [vmem:[#allocation5 + $0x2a0] ss:$8 sps:$4 sm:$0xff]  }
  0x51   :  { %701 = vmatprep.subr.bf16.mxu0 %v1268_v43  ;;  %741 = vmatpush2.bf16.msra.mxu1 %v1267_v44  ;;  %v1342_v43 = vld [vmem:[#allocation5 + $0x294] ss:$8 sps:$4 sm:$0xff]   ;;  %v1340_v44 = vld [vmem:[#allocation5 + $0x290] ss:$8 sps:$4 sm:$0xff]  }
  0x52   :  { %742 = vmatprep.subr.bf16.mxu1 %v1271_v45  ;;  %v1348_v45 = vld [vmem:[#allocation5 + $0x284] ss:$8 sps:$4 sm:$0xff]  }
  0x54   :  { %702 = vmatpush2.bf16.msra.mxu0 %v1270_v47  ;;  %v65_v47 = vld [vmem:[#allocation2 + $0x20] sm:$0xff] }
  0x55   :  { %703 = vmatprep.subr.bf16.mxu0 %v1274_v49  ;;  %743 = vmatpush2.bf16.msra.mxu1 %v1273_v51  ;;  %v72_v48 = vpack.c.bf16 %v65_v47, %v65_v47  ;;  %v1349_v49 = vld [vmem:[#allocation7 + $0x78] sm:$0xff]   ;;  %v1351_v51 = vld [vmem:[#allocation7 + $0x70] sm:$0xff]  }
  0x56   :  { %744 = vmatprep.subr.bf16.mxu1 %v1277_v53  ;;  %v1353_v53 = vld [vmem:[#allocation7 + $0x68] sm:$0xff]  }
  0x58   :  { %704 = vmatpush2.bf16.msra.mxu0 %v1276_v54  ;;  %v1354_v54 = vld [vmem:[#allocation7 + $0x28] sm:$0xff]  }
  0x59   :  { %705 = vmatprep.subr.bf16.mxu0 %v1280_v55  ;;  %745 = vmatpush2.bf16.msra.mxu1 %v1279_v56  ;;  %v1355_v55 = vld [vmem:[#allocation7 + $0x60] sm:$0xff]  }
  0x5a   :  { %746 = vmatprep.subr.bf16.mxu1 %v1283_v57  ;;  %v1356_v56 = vld [vmem:[#allocation7 + $0x20] sm:$0xff]   ;;  %v1357_v57 = vld [vmem:[#allocation7 + $0x58] sm:$0xff]  }
  0x5c   :  { %706 = vmatpush2.bf16.msra.mxu0 %v1282_v58  ;;  %v1358_v58 = vld [vmem:[#allocation7 + $0x18] sm:$0xff]  }
  0x5d   :  { %707 = vmatprep.subr.bf16.mxu0 %v1286_v59  ;;  %747 = vmatpush2.bf16.msra.mxu1 %v1285_v60  ;;  %v1359_v59 = vld [vmem:[#allocation7 + $0x50] sm:$0xff]  }
  0x5e   :  { %748 = vmatprep.subr.bf16.mxu1 %v1289_v61  ;;  %v1360_v60 = vld [vmem:[#allocation7 + $0x10] sm:$0xff]   ;;  %v1361_v61 = vld [vmem:[#allocation7 + $0x48] sm:$0xff]  }
  0x60   :  { %708 = vmatpush2.bf16.msra.mxu0 %v1288_v62  ;;  %v1362_v62 = vld [vmem:[#allocation7 + $0x8] sm:$0xff]  }
  0x61   :  { %709 = vmatprep.subr.bf16.mxu0 %v1292_v63  ;;  %749 = vmatpush2.bf16.msra.mxu1 %v1291_v0  ;;  %v1363_v63 = vld [vmem:[#allocation7 + $0x40] sm:$0xff]  }
  0x62   :  { %750 = vmatprep.subr.bf16.mxu1 %v1295_v2  ;;  %v1364_v0 = vld [vmem:[#allocation7] sm:$0xff]  }
  0x64   :  { %710 = vmatpush2.bf16.msra.mxu0 %v1294_v1 }
  0x65   :  { %761 = vmatprep.subr.bf16.mxu0 %v1300_v5  ;;  %751 = vmatpush2.bf16.msra.mxu1 %v1297_v3 }
  0x66   :  { %816 = vmatprep.subr.bf16.mxu1 %v1345_v12 }
  0x67   :  { %712 = vmatmul.mubr.bf16.vlgmr.msra.gmra.mxu0 %v68_v7 }
  0x68   :  { %762 = vmatpush1.bf16.msra.mxu0 %v1298_v8  ;;  %753 = vmatmul.mubr.bf16.vlgmr.msra.gmra.mxu1 %v70_v10 }
  0x69   :  { %763 = vmatprep.subr.bf16.mxu0 %v1303_v9  ;;  %817 = vmatpush1.bf16.msra.mxu1 %v1343_v11 }
  0x6a   :  { %834 = vmatprep.mubr.bf16.mxu1 %v1466_v19  ;;  %793 = vmatprep.mubr.bf16.mxu0 %v73_v17 }
  0x6b   :  { %1171 = vmatprep.subr.bf16.mxu1 %v1349_v49 }
  0x6c   :  { %764 = vmatpush1.bf16.msra.mxu0 %v1301_v13  ;;  %v175_v13 = vlaneseq }
  0x6d   :  { %765 = vmatprep.subr.bf16.mxu0 %v1306_v14 }
  0x6e   :  { %v176_v14 = vshrl.u32 %v175_v13, 7 }
  0x70   :  { %766 = vmatpush1.bf16.msra.mxu0 %v1304_v18  ;;  %1153 = vmatmul.mubr.msk.bf16.vlgmr.msra.gmra.mxu1 %vm675_vm0, %v74_v21  ;;  %v177_v15 = vsub.s32 0, %v176_v14  ;;  %v181_v17 = vsub.s32 1, %v176_v14 }
  0x71   :  { %767 = vmatprep.subr.bf16.mxu0 %v1309_v20  ;;  %1172 = vmatpush3.bf16.msra.mxu1 %v1350_v50 }
  0x72   :  { %1173 = vmatprep.subr.bf16.mxu1 %v1351_v51  ;;  %v178_v18 = vrot.slane %v173_v16, %v177_v15  ;;  %v182_v19 = vrot.slane %v173_v16, %v181_v17 }
  0x74   :  { %768 = vmatpush1.bf16.msra.mxu0 %v1307_v22 }
  0x75   :  { %769 = vmatprep.subr.bf16.mxu0 %v1312_v23  ;;  %1174 = vmatpush3.bf16.msra.mxu1 %v1352_v52 }
  0x76   :  { %1175 = vmatprep.subr.bf16.mxu1 %v1353_v53 }
  0x78   :  { %770 = vmatpush1.bf16.msra.mxu0 %v1310_v24 }
  0x79   :  { %771 = vmatprep.subr.bf16.mxu0 %v1315_v25  ;;  %1176 = vmatpush3.bf16.msra.mxu1 %v1354_v54 }
  0x7a   :  { %1177 = vmatprep.subr.bf16.mxu1 %v1355_v55 }
  0x7c   :  { %772 = vmatpush1.bf16.msra.mxu0 %v1313_v26 }
  0x7d   :  { %773 = vmatprep.subr.bf16.mxu0 %v1318_v27  ;;  %1178 = vmatpush3.bf16.msra.mxu1 %v1356_v56 }
  0x7e   :  { %1179 = vmatprep.subr.bf16.mxu1 %v1357_v57 }
  0x80   :  { %774 = vmatpush1.bf16.msra.mxu0 %v1316_v28 }
  0x81   :  { %775 = vmatprep.subr.bf16.mxu0 %v1321_v29  ;;  %1180 = vmatpush3.bf16.msra.mxu1 %v1358_v58 }
  0x82   :  { %1181 = vmatprep.subr.bf16.mxu1 %v1359_v59 }
  0x84   :  { %776 = vmatpush1.bf16.msra.mxu0 %v1319_v30 }
  0x85   :  { %777 = vmatprep.subr.bf16.mxu0 %v1324_v31  ;;  %1182 = vmatpush3.bf16.msra.mxu1 %v1360_v60 }
  0x86   :  { %1183 = vmatprep.subr.bf16.mxu1 %v1361_v61 }
  0x88   :  { %778 = vmatpush2.bf16.msra.mxu0 %v1322_v32 }
  0x89   :  { %779 = vmatprep.subr.bf16.mxu0 %v1327_v33  ;;  %1184 = vmatpush3.bf16.msra.mxu1 %v1362_v62 }
  0x8a   :  { %1185 = vmatprep.subr.bf16.mxu1 %v1363_v63 }
  0x8c   :  { %780 = vmatpush2.bf16.msra.mxu0 %v1325_v34 }
  0x8d   :  { %781 = vmatprep.subr.bf16.mxu0 %v1330_v35  ;;  %1186 = vmatpush3.bf16.msra.mxu1 %v1364_v0 }
  0x90   :  { %782 = vmatpush2.bf16.msra.mxu0 %v1328_v36 }
  0x91   :  { %783 = vmatprep.subr.bf16.mxu0 %v1333_v37 }
  0x94   :  { %784 = vmatpush2.bf16.msra.mxu0 %v1331_v38 }
  0x95   :  { %785 = vmatprep.subr.bf16.mxu0 %v1336_v39 }
  0x98   :  { %786 = vmatpush2.bf16.msra.mxu0 %v1334_v40 }
  0x99   :  { %787 = vmatprep.subr.bf16.mxu0 %v1339_v41 }
  0x9c   :  { %788 = vmatpush2.bf16.msra.mxu0 %v1337_v42 }
  0x9d   :  { %789 = vmatprep.subr.bf16.mxu0 %v1342_v43 }
  0xa0   :  { %790 = vmatpush2.bf16.msra.mxu0 %v1340_v44  ;;  %v1154_v44 = vld [vmem:[%s1521_s4] ss:$0 sm:$0xff]  ;;  %s1433_s4 = scalar_lea.vmem %s1046_s13, 64 }
  0xa1   :  { %791 = vmatprep.subr.bf16.mxu0 %v1348_v45  ;;  %p1434_p1 = scmp.ne.s32.totalorder %s1046_s13, %s1433_s4  ;;  %p1439_p3 = scmp.lt.s32.totalorder %s1433_s4, %s1433_s4 }
  0xa3   :  { %p1440_p4 = por %p1439_p3, %p1438_p2 }
  0xa4   :  { %792 = vmatpush2.bf16.msra.mxu0 %v1346_v46 }
  0xa5   :  { %p1441_p5 = pnand %p1440_p4, %p1434_p1 }
  0xa7   :  { %794 = vmatmul.mubr.bf16.vlgmr.msra.gmra.mxu0 %v72_v48 }
 0x127   :  { %v713_v1 = vpop.f32.mrf.mxu0 }
 0x128   :  { %v754_v3 = vpop.f32.mrf.mxu1  ;;  %v714_v20 = vadd.f32 %v713_v1, %v178_v18 }
 0x129   :  { %v715_v2 = vpop.f32.mrf.mxu0 }
 0x12a   :  { %v756_v5 = vpop.f32.mrf.mxu1  ;;  %v716_v21 = vadd.f32 %v715_v2, %v182_v19  ;;  %v755_v22 = vadd.f32 %v754_v3, %v714_v20 }
 0x12b   :  { %v717_v4 = vpop.f32.mrf.mxu0 }
 0x12c   :  { %v758_v7 = vpop.f32.mrf.mxu1  ;;  %v757_v24 = vadd.f32 %v756_v5, %v716_v21 }
 0x12d   :  { %v718_v6 = vpop.f32.mrf.mxu0 }
 0x12e   :  { %v759_v8 = vpop.f32.mrf.mxu1 }
 0x130   :  { %v836_v9 = vpop.f32.mrf.mxu1 }
 0x132   :  { %v838_v10 = vpop.f32.mrf.mxu1 }
 0x134   :  { %v840_v11 = vpop.f32.mrf.mxu1 }
 0x136   :  { %v841_v12 = vpop.f32.mrf.mxu1 }
 0x167   :  { %v795_v23 = vpop.f32.mrf.mxu0 }
 0x168   :  { %v796_v25 = vadd.f32 %v795_v23, %v755_v22 }
 0x169   :  { %v797_v26 = vpop.f32.mrf.mxu0 }
 0x16a   :  { %v837_v27 = vadd.f32 %v836_v9, %v796_v25  ;;  %v798_v28 = vadd.f32 %v797_v26, %v757_v24 }
 0x16b   :  { %v799_v29 = vpop.f32.mrf.mxu0 }
 0x16c   :  { %v843_v30 = vmul.f32 0.5, %v837_v27  ;;  %v839_v31 = vadd.f32 %v838_v10, %v798_v28 }
 0x16d   :  { %v800_v32 = vpop.f32.mrf.mxu0 }
 0x16e   :  { %1365 = vtanh.f32 %v843_v30  ;;  %v844_v33 = vmul.f32 0.5, %v839_v31 }
 0x170   :  { %1367 = vtanh.f32 %v844_v33 }
 0x17b   :  { %v1366_v34 = vpop.eup %1365 }
 0x17c   :  { %v847_v35 = vmul.f32 0.5, %v1366_v34 }
 0x17d   :  { %v1368_v36 = vpop.eup %1367 }
 0x17e   :  { %v848_v37 = vmul.f32 0.5, %v1368_v36  ;;  %v849_v38 = vadd.f32 0.5, %v847_v35 }
 0x180   :  { %v850_v39 = vadd.f32 0.5, %v848_v37  ;;  %v851_v41 = vpack.c.bf16 %v849_v38, %v849_v38 }
 0x182   :  { %v852_v40 = vpack.c.bf16 %v850_v39, %v850_v39 }
 0x184   :  { %1020 = vmatprep.mubr.bf16.mxu1 %v852_v40 }
 0x185   :  { %1021 = vmatmul.mubr.bf16.vlgmr.msra.gmra.mxu1 %v851_v41 }
 0x245   :  { %v1187_v42 = vpop.f32.mrf.mxu1 }
 0x247   :  { %v1188_v43 = vpop.f32.mrf.mxu1 }
 0x248   :  { %v1189_v45 = vadd.f32 %v1188_v43, %v1187_v42 }
 0x249   :  { %v1190_v46 = vpop.f32.mrf.mxu1 }
 0x24a   :  { %v1023_v47 = vadd.f32 %v1189_v45, %v1154_v44 }
 0x24b   :  { %v1191_v48 = vpop.f32.mrf.mxu1 }
 0x24c   :  { %1028 = vmax.xlane.f32.xlu0 %v1023_v47 }
 0x2d5   :  { %v1029_v49 = vpop.xlane.xlu0 %1028 }
 0x2d6   :  { %v1030_v50 = vsub.f32 %v1023_v47, %v1029_v49 }
 0x2d8   :  { %v1031_v51 = vmul.f32 1.442695, %v1030_v50 }
 0x2da   :  { %1369 = vpow2.f32 %v1031_v51 }
 0x2e7   :  { %v1370_v52 = vpop.eup %1369 }
 0x2e8   :  { %1033 = vadd.xlane.f32.xlu0 %v1370_v52 }
 0x371   :  { %v1034_v53 = vpop.xlane.xlu0 %1033 }
 0x372   :  { %1371 = vrcp.f32 %v1034_v53 }
 0x37f   :  { %v1372_v54 = vpop.eup %1371 }
 0x380   :  { %v1036_v55 = vmul.f32 %v1372_v54, %v1370_v52 }
 0x382   :  { %v1037_v56 = vpack.c.bf16 %v1036_v55, %v1036_v55 }
 0x384   :  { %1038 = vst [vmem:[#allocation8] sm:$0xf] %v1037_v56 }
 0x385   :  { %1444 = shalt.err (!%p1441_p5)
}
 0x386   :  { %1048 = dma.vmem_to_hbm [thread:$0]  %s1046_s13, 64, %s1522_s5, [#allocation4]  }
 0x387   :  { %1457 = dma.done.wait [#allocation4], 64  }
 0x388   :  { %1458 = vsyncadd [#allocation4], 4294967232 }
 0x389   :  { %1052 = vsyncpa [#allocation3], 1 }
 0x38a   :  { %1053 = vsyncpa [#allocation6], 1 }
 0x38b   :  { %1054 = vsyncpa [#allocation4], 1 }

</bundles_post_ra>
